<compile_context>
chip_gen: v7x
topology: tpu7x:2x2x1
jax: 0.10.0
libtpu: 0.0.40
codegen_flags: <defaults>
</compile_context>

<pallas_src>
import functools

import jax
import jax.numpy as jnp
from jax.experimental import pallas as pl
from jax.experimental.pallas import tpu as pltpu

_LANE = 128


def _loss_kernel(*refs, scales, rows, block_rows, tiles_per_split,
                 need_mask, last_tile):
    """Accumulate sum_k scales[k] * sum(y_k * log(x_k)) over row tiles.

    refs = (y_0, x_0, ..., y_{P-1}, x_{P-1}, out_ref, acc_ref)
    """
    num_pairs = len(scales)
    in_refs = refs[:2 * num_pairs]
    out_ref = refs[2 * num_pairs]
    acc_ref = refs[2 * num_pairs + 1]

    c = pl.program_id(0)   # split axis ("parallel"; one chunk per TensorCore)
    i = pl.program_id(1)   # reduction axis ("arbitrary")

    # Fold each (block_rows, 128) tile down to one (8, 128) vreg so the
    # accumulator RMW is a single vld + vst per step.  Only possible when
    # block_rows is a multiple of 8 (always true except for tiny full-array
    # blocks, where the acc is simply full-size).
    fold = (block_rows % 8 == 0)

    @pl.when(i == 0)
    def _():
        acc_ref[...] = jnp.zeros_like(acc_ref)

    def tile_contrib(mask):
        contrib = None
        for k in range(num_pairs):
            y = in_refs[2 * k][...].astype(jnp.float32)
            x = in_refs[2 * k + 1][...].astype(jnp.float32)
            if mask is not None:
                # Neutral values for rows past the end of the slab (avoids
                # NaN/Inf from garbage in partially OOB tiles before the log).
                x = jnp.where(mask, x, 1.0)
                y = jnp.where(mask, y, 0.0)
            term = y * jnp.log(x)
            if scales[k] != 1.0:          # hoisted when both scales are equal
                term = term * scales[k]
            contrib = term if contrib is None else contrib + term
        if fold:
            contrib = contrib.reshape(block_rows // 8, 8, _LANE).sum(axis=0)
        return contrib

    if need_mask:
        t = c * tiles_per_split + i

        @pl.when(t < last_tile)           # steady state: no mask, no iota
        def _():
            acc_ref[...] += tile_contrib(None)

        @pl.when(t >= last_tile)          # ragged last tile / clamped dupes
        def _():
            tile_start = t * block_rows
            row_ids = (jax.lax.broadcasted_iota(
                jnp.int32, (block_rows, _LANE), 0) + tile_start)
            acc_ref[...] += tile_contrib(row_ids < rows)
    else:
        acc_ref[...] += tile_contrib(None)

    @pl.when(i == tiles_per_split - 1)
    def _():
        # Single cross-lane/sublane reduce per split, stored as SMEM scalar.
        out_ref[0, 0] = jnp.sum(acc_ref[...])


def _device_defaults():
    """(block_rows, num_split) tuned per TPU generation."""
    try:
        kind = jax.devices()[0].device_kind.lower()
    except Exception:
        kind = ""
    if "v7" in kind:
        # 2 TensorCores + ~3.2 TB/s HBM: bigger tiles keep the 0.35 us/step
        # overhead hidden, and the 2-way "parallel" row split puts one half of
        # the reduction on each core.  8 x 2 MiB buffers + acc fits the 32 MiB
        # scoped default comfortably.
        return 4096, 2
    # v5e / v6e (single TensorCore): no split axis (avoids always-on masking
    # and duplicate clamped-tile DMAs); 2048-row tiles (1 MiB/stream, 8 MiB
    # double-buffered for 4 streams) sit near the HBM roofline and inside
    # v5e's 16 MiB scoped-VMEM default.
    return 2048, 1


def _to_lane_slab(a, pad_value, dtype):
    """Flatten to a lane-dense (rows, 128) slab.

    Copy-free reshape when numel % 128 == 0; otherwise a tiny (<128 element)
    tail pad with a neutral value (x -> 1, y -> 0)."""
    flat = a.reshape(-1).astype(dtype)
    pad = (-flat.shape[0]) % _LANE
    if pad:
        flat = jnp.pad(flat, (0, pad), constant_values=pad_value)
    return flat.reshape(-1, _LANE)


def _sum_y_logx(pairs, scales, *, block_rows=None, num_split=None,
                y_dtype=jnp.float32):
    """One pallas_call computing sum_k scales[k] * sum(y_k * log(x_k)).

    All pairs must flatten to the same number of (., 128) rows."""
    dflt_block_rows, dflt_split = _device_defaults()
    if block_rows is None:
        block_rows = dflt_block_rows
    if num_split is None:
        num_split = dflt_split

    operands = []
    rows = None
    for (y, x) in pairs:
        assert y.shape == x.shape, (y.shape, x.shape)
        # y only multiplies -> may stream as bf16 (y_dtype); x feeds log(),
        # keep it f32 for exact parity with the PyTorch reference.
        y2 = _to_lane_slab(y, 0.0, y_dtype)
        x2 = _to_lane_slab(x, 1.0, jnp.float32)
        if rows is None:
            rows = x2.shape[0]
        else:
            assert x2.shape[0] == rows
        operands += [y2, x2]

    block_rows = min(block_rows, rows)               # full-dim block if small
    total_tiles = pl.cdiv(rows, block_rows)
    num_split_eff = max(1, min(num_split, total_tiles))
    tiles_per_split = pl.cdiv(total_tiles, num_split_eff)
    need_mask = (num_split_eff * tiles_per_split * block_rows != rows)
    last_tile = total_tiles - 1

    def in_map(c, i):
        t = c * tiles_per_split + i
        if need_mask:
            t = jnp.minimum(t, last_tile)   # never point a block fully OOB
        return (t, 0)

    kernel = functools.partial(
        _loss_kernel,
        scales=tuple(float(s) for s in scales),
        rows=rows,
        block_rows=block_rows,
        tiles_per_split=tiles_per_split,
        need_mask=need_mask,
        last_tile=last_tile,
    )

    in_specs = [pl.BlockSpec((block_rows, _LANE), in_map) for _ in operands]
    acc_rows = 8 if block_rows % 8 == 0 else block_rows

    # Explicit VMEM budget: double-buffered input tiles + accumulator + slack.
    tile_bytes = sum(2 * block_rows * _LANE * op.dtype.itemsize
                     for op in operands)
    vmem_limit = max(int(tile_bytes * 1.25) + (4 << 20), 16 << 20)

    partials = pl.pallas_call(
        kernel,
        out_shape=jax.ShapeDtypeStruct((num_split_eff, 1), jnp.float32),
        grid_spec=pltpu.PrefetchScalarGridSpec(
            num_scalar_prefetch=0,
            grid=(num_split_eff, tiles_per_split),
            in_specs=in_specs,
            out_specs=pl.BlockSpec((1, 1), lambda c, i: (c, 0),
                                   memory_space=pltpu.MemorySpace.SMEM),
            scratch_shapes=[pltpu.VMEM((acc_rows, _LANE), jnp.float32)],
        ),
        compiler_params=pltpu.CompilerParams(
            dimension_semantics=("parallel", "arbitrary"),
            vmem_limit_bytes=vmem_limit),
    )(*operands)
    return jnp.sum(partials)


def ce_loss(y, x, **kw):
    """Pallas implementation of CE_Loss.forward(y, x) for NCHW inputs."""
    assert x.ndim == 4
    s = 1.0 / float(x.shape[2] * x.shape[3])
    return -(s * _sum_y_logx([(y, x)], [1.0], **kw))


def bl_loss(y1, x1, y2, x2, **kw):
    """Pallas implementation of BL_Loss.forward (CE(y1,x1) + CE(y2,x2))."""
    assert x1.ndim == 4 and x2.ndim == 4
    s1 = 1.0 / float(x1.shape[2] * x1.shape[3])
    s2 = 1.0 / float(x2.shape[2] * x2.shape[3])
    if x1.size == x2.size:
        # Common case: both branches flatten to the same slab -> one fused
        # pallas_call (4 input streams, one DMA pipeline).  The 1/(H*W) scale
        # is hoisted out of the per-element multiply (only the ratio s2/s1
        # stays in-kernel, and it is skipped entirely when equal).
        return -(s1 * _sum_y_logx([(y1, x1), (y2, x2)], [1.0, s2 / s1], **kw))
    # Fallback: different element counts -> two calls with the same kernel.
    return (-(s1 * _sum_y_logx([(y1, x1)], [1.0], **kw))
            - (s2 * _sum_y_logx([(y2, x2)], [1.0], **kw)))


if __name__ == "__main__":
    key = jax.random.PRNGKey(0)

    def ce_ref(y, x):
        S = x.shape[2] * x.shape[3]
        return -jnp.sum(jnp.log(x) * y) / S

    def check(y1, x1, y2, x2, **kw):
        got = jax.block_until_ready(bl_loss(y1, x1, y2, x2, **kw))
        ref = ce_ref(y1, x1) + ce_ref(y2, x2)
        assert jnp.allclose(got, ref, rtol=1e-5, atol=1e-5), (got, ref)

    keys = jax.random.split(key, 12)

    def mk(k, shape):
        # strictly positive probability-like maps (x goes through log)
        return jax.nn.softmax(jax.random.normal(k, shape, jnp.float32), axis=1)

    # 1) primary small case (B, C, H, W) = (2, 4, 16, 16): fused single-tile
    s = (2, 4, 16, 16)
    check(mk(keys[0], s), mk(keys[1], s), mk(keys[2], s), mk(keys[3], s))

    # 2) multi-tile case (rows = 2500): ragged-tail masked path with the
    #    device defaults, then forced split axis + clamped duplicate tile.
    s = (1, 5, 500, 128)
    check(mk(keys[4], s), mk(keys[5], s), mk(keys[6], s), mk(keys[7], s))
    check(mk(keys[4], s), mk(keys[5], s), mk(keys[6], s), mk(keys[7], s),
          block_rows=1024, num_split=2)

    # 3) mismatched branch shapes: falls back to two single-pair calls,
    #    including a sub-lane tail pad (2400 elements -> 19 rows, no 8-fold)
    sa, sb = (2, 4, 16, 16), (2, 3, 20, 20)
    check(mk(keys[8], sa), mk(keys[9], sa), mk(keys[10], sb), mk(keys[11], sb))

    print("KERNEL_OK")
</pallas_src>

<mosaic_0001>
module attributes {stable_mosaic.version = 11 : i64} {
  func.func @_loss_kernel(%arg0: i32, %arg1: i32, %arg2: memref<16x128xf32, #tpu.memory_space<vmem>>, %arg3: memref<16x128xf32, #tpu.memory_space<vmem>>, %arg4: memref<16x128xf32, #tpu.memory_space<vmem>>, %arg5: memref<16x128xf32, #tpu.memory_space<vmem>>, %arg6: memref<1x1xf32, #tpu.memory_space<smem>>, %arg7: memref<8x128xf32, #tpu.memory_space<vmem>>) attributes {dimension_semantics = [#tpu.dimension_semantics<parallel>, #tpu.dimension_semantics<arbitrary>], iteration_bounds = array<i64: 1, 1>, scalar_prefetch = 0 : i64, scratch_operands = 1 : i64, tpu.core_type = #tpu.core_type<tc>, window_params = [{transform_indices = @transform_0, window_bounds = array<i64: 16, 128>}, {transform_indices = @transform_1, window_bounds = array<i64: 16, 128>}, {transform_indices = @transform_2, window_bounds = array<i64: 16, 128>}, {transform_indices = @transform_3, window_bounds = array<i64: 16, 128>}, {transform_indices = @transform_4, window_bounds = array<i64: 1, 1>}]} {
    %c0_i32 = arith.constant 0 : i32
    %0 = arith.cmpi eq, %arg1, %c0_i32 : i32
    %1 = arith.extui %0 : i1 to i32
    %c0_i32_0 = arith.constant 0 : i32
    %2 = arith.cmpi ne, %1, %c0_i32_0 : i32
    scf.if %2 {
      %cst_14 = arith.constant 0.000000e+00 : f32
      %20 = vector.broadcast %cst_14 : f32 to vector<8x128xf32>
      %c0_15 = arith.constant 0 : index
      %c0_16 = arith.constant 0 : index
      %21 = vector.load %arg7[%c0_15, %c0_16] : memref<8x128xf32, #tpu.memory_space<vmem>>, vector<8x128xf32>
      tpu.vector_store %arg7[%c0_15, %c0_16], %20 {strides = array<i32>} : memref<8x128xf32, #tpu.memory_space<vmem>>, vector<8x128xf32>,
    } else {
    }
    %c0 = arith.constant 0 : index
    %c0_1 = arith.constant 0 : index
    %3 = vector.load %arg7[%c0, %c0_1] : memref<8x128xf32, #tpu.memory_space<vmem>>, vector<8x128xf32>
    %c0_2 = arith.constant 0 : index
    %c0_3 = arith.constant 0 : index
    %4 = vector.load %arg2[%c0_2, %c0_3] : memref<16x128xf32, #tpu.memory_space<vmem>>, vector<16x128xf32>
    %c0_4 = arith.constant 0 : index
    %c0_5 = arith.constant 0 : index
    %5 = vector.load %arg3[%c0_4, %c0_5] : memref<16x128xf32, #tpu.memory_space<vmem>>, vector<16x128xf32>
    %6 = math.log %5 : vector<16x128xf32>
    %7 = arith.mulf %4, %6 : vector<16x128xf32>
    %c0_6 = arith.constant 0 : index
    %c0_7 = arith.constant 0 : index
    %8 = vector.load %arg4[%c0_6, %c0_7] : memref<16x128xf32, #tpu.memory_space<vmem>>, vector<16x128xf32>
    %c0_8 = arith.constant 0 : index
    %c0_9 = arith.constant 0 : index
    %9 = vector.load %arg5[%c0_8, %c0_9] : memref<16x128xf32, #tpu.memory_space<vmem>>, vector<16x128xf32>
    %10 = math.log %9 : vector<16x128xf32>
    %11 = arith.mulf %8, %10 : vector<16x128xf32>
    %12 = arith.addf %7, %11 : vector<16x128xf32>
    %13 = vector.shape_cast %12 : vector<16x128xf32> to vector<2x8x128xf32>
    %cst = arith.constant dense<0.000000e+00> : vector<8x128xf32>
    %14 = vector.multi_reduction <add>, %13, %cst [0] : vector<2x8x128xf32> to vector<8x128xf32>
    %15 = arith.addf %3, %14 : vector<8x128xf32>
    %c0_10 = arith.constant 0 : index
    %c0_11 = arith.constant 0 : index
    %16 = vector.load %arg7[%c0_10, %c0_11] : memref<8x128xf32, #tpu.memory_space<vmem>>, vector<8x128xf32>
    tpu.vector_store %arg7[%c0_10, %c0_11], %15 {strides = array<i32>} : memref<8x128xf32, #tpu.memory_space<vmem>>, vector<8x128xf32>,
    %c0_i32_12 = arith.constant 0 : i32
    %17 = arith.cmpi eq, %arg1, %c0_i32_12 : i32
    %18 = arith.extui %17 : i1 to i32
    %c0_i32_13 = arith.constant 0 : i32
    %19 = arith.cmpi ne, %18, %c0_i32_13 : i32
    scf.if %19 {
      %c0_14 = arith.constant 0 : index
      %c0_15 = arith.constant 0 : index
      %20 = vector.load %arg7[%c0_14, %c0_15] : memref<8x128xf32, #tpu.memory_space<vmem>>, vector<8x128xf32>
      %21 = vector.shape_cast %20 : vector<8x128xf32> to vector<1x8x128xf32>
      %cst_16 = arith.constant dense<0.000000e+00> : vector<1xf32>
      %22 = vector.multi_reduction <add>, %21, %cst_16 [1, 2] : vector<1x8x128xf32> to vector<1xf32>
      %23 = vector.shape_cast %22 : vector<1xf32> to vector<1x1x1xf32>
      %24 = vector.extract %23[0, 0, 0] : f32 from vector<1x1x1xf32>
      %c0_17 = arith.constant 0 : index
      %c0_18 = arith.constant 0 : index
      %25 = memref.load %arg6[%c0_17, %c0_18] : memref<1x1xf32, #tpu.memory_space<smem>>
      memref.store %24, %arg6[%c0_17, %c0_18] : memref<1x1xf32, #tpu.memory_space<smem>>
    } else {
    }
    return
  }
  func.func @transform_0(%arg0: i32, %arg1: i32) -> (i32, i32) {
    %c1_i32 = arith.constant 1 : i32
    %0 = arith.muli %arg0, %c1_i32 : i32
    %1 = arith.addi %0, %arg1 : i32
    %c0_i32 = arith.constant 0 : i32
    %c0_i32_0 = arith.constant 0 : i32
    return %1, %c0_i32 : i32, i32
  }
  func.func @transform_1(%arg0: i32, %arg1: i32) -> (i32, i32) {
    %c1_i32 = arith.constant 1 : i32
    %0 = arith.muli %arg0, %c1_i32 : i32
    %1 = arith.addi %0, %arg1 : i32
    %c0_i32 = arith.constant 0 : i32
    %c0_i32_0 = arith.constant 0 : i32
    return %1, %c0_i32 : i32, i32
  }
  func.func @transform_2(%arg0: i32, %arg1: i32) -> (i32, i32) {
    %c1_i32 = arith.constant 1 : i32
    %0 = arith.muli %arg0, %c1_i32 : i32
    %1 = arith.addi %0, %arg1 : i32
    %c0_i32 = arith.constant 0 : i32
    %c0_i32_0 = arith.constant 0 : i32
    return %1, %c0_i32 : i32, i32
  }
  func.func @transform_3(%arg0: i32, %arg1: i32) -> (i32, i32) {
    %c1_i32 = arith.constant 1 : i32
    %0 = arith.muli %arg0, %c1_i32 : i32
    %1 = arith.addi %0, %arg1 : i32
    %c0_i32 = arith.constant 0 : i32
    %c0_i32_0 = arith.constant 0 : i32
    return %1, %c0_i32 : i32, i32
  }
  func.func @transform_4(%arg0: i32, %arg1: i32) -> (i32, i32) {
    %c0_i32 = arith.constant 0 : i32
    %c0_i32_0 = arith.constant 0 : i32
    return %arg0, %c0_i32 : i32, i32
  }
}

</mosaic_0001>

<bundles_post_ra>
// kernel: tpu_custom_call.1
= control target key start
LH: loop header
LB: loop body
LE: loop exit
PB: predicated region body
PF: predicated region fallthrough
CT: control target
= control target key end

     0   :  { %9 = vsyncpa [#allocation4], 0  ;;  %s400_s0 = inlined_call_operand.hbm [shape: f32[16,128], index: 0, kind: input, shape index: {}]   ;;  %s401_s1 = inlined_call_operand.hbm [shape: f32[16,128], index: 1, kind: input, shape index: {}]   ;;  %s402_s2 = inlined_call_operand.hbm [shape: f32[16,128], index: 2, kind: input, shape index: {}]   ;;  %s403_s3 = inlined_call_operand.hbm [shape: f32[16,128], index: 3, kind: input, shape index: {}]   ;;  %s404_s4 = inlined_call_operand.hbm [shape: f32[1,1], index: 4, kind: output, shape index: {}]  }
   0x1   :  { %10 = vsyncpa [#allocation7], 0 }
   0x2   :  { %11 = vsyncpa [#allocation10], 0 }
   0x3   :  { %12 = vsyncpa [#allocation5], 0  ;;  %s282_s15 = smov [#allocation6]   ;;  %s283_s17 = smov [#allocation3]  }
   0x4   :  { %s38_s16 = sshll.u32 %s282_s15, 4  ;;  %s22_s18 = sshll.u32 %s283_s17, 4  ;;  %s39_s16 = int_to_ptr.vmem [resolvable:$true] %s38_s16  ;;  %s314_s18 = int_to_ptr.vmem [resolvable:$true] %s22_s18 }
   0x5   :  { %s176_s21 = scalar_lea.hbm %s401_s1, 256 }
   0x6   :  { %p177_p0 = scmp.ne.s32.totalorder %s401_s1, %s176_s21  ;;  %p180_p1 = scmp.lt.u32.totalorder %s176_s21, %s401_s1 }
   0x8   :  { %p182_p2 = pnand %p180_p1, %p177_p0 }
   0xa   :  { %185 = shalt.err (!%p182_p2)
}
   0xb   :  { %s186_s26 = scalar_lea.vmem %s39_s16, 256  ;;  %p191_p4 = scmp.lt.s32.totalorder %s39_s16, %s39_s16 }
   0xc   :  { %p187_p3 = scmp.ne.s32.totalorder %s39_s16, %s186_s26  ;;  %p192_p5 = scmp.lt.s32.totalorder %s186_s26, %s186_s26 }
   0xe   :  { %p193_p6 = por %p192_p5, %p191_p4 }
  0x10   :  { %p194_p7 = pnand %p193_p6, %p187_p3 }
  0x12   :  { %197 = shalt.err (!%p194_p7)
}
  0x13   :  { %s284_s27 = smov 128   ;;  %s285_s28 = smov 8  }
  0x14   :  { %44 = dma.hbm_to_vmem [thread:$0]  %s401_s1, 256, %s39_s16, [#allocation7], %s284_s27, %s284_s27, %s285_s28  }
  0x15   :  { %s198_s7 = scalar_lea.hbm %s400_s0, 256 }
  0x16   :  { %p199_p8 = scmp.ne.s32.totalorder %s400_s0, %s198_s7  ;;  %p202_p9 = scmp.lt.u32.totalorder %s198_s7, %s400_s0 }
  0x18   :  { %p204_p10 = pnand %p202_p9, %p199_p8 }
  0x1a   :  { %207 = shalt.err (!%p204_p10)
}
  0x1b   :  { %s208_s12 = scalar_lea.vmem %s314_s18, 256  ;;  %p213_p12 = scmp.lt.s32.totalorder %s314_s18, %s314_s18 }
  0x1c   :  { %p209_p11 = scmp.ne.s32.totalorder %s314_s18, %s208_s12  ;;  %p214_p13 = scmp.lt.s32.totalorder %s208_s12, %s208_s12 }
  0x1e   :  { %p215_p0 = por %p214_p13, %p213_p12 }
  0x20   :  { %p216_p1 = pnand %p215_p0, %p209_p11 }
  0x22   :  { %219 = shalt.err (!%p216_p1)
}
  0x23   :  { %28 = dma.hbm_to_vmem [thread:$0]  %s400_s0, 256, %s314_s18, [#allocation4], %s284_s27, %s284_s27, %s285_s28  }
  0x24   :  { %s286_s14 = smov [#allocation8]   ;;  %s287_s16 = smov [#allocation9]  }
  0x25   :  { %s54_s15 = sshll.u32 %s286_s14, 4  ;;  %s70_s17 = sshll.u32 %s287_s16, 4  ;;  %s55_s15 = int_to_ptr.vmem [resolvable:$true] %s54_s15  ;;  %s351_s17 = int_to_ptr.vmem [resolvable:$true] %s70_s17 }
  0x26   :  { %s220_s21 = scalar_lea.hbm %s402_s2, 256 }
  0x27   :  { %p221_p2 = scmp.ne.s32.totalorder %s402_s2, %s220_s21  ;;  %p224_p3 = scmp.lt.u32.totalorder %s220_s21, %s402_s2 }
  0x29   :  { %p226_p4 = pnand %p224_p3, %p221_p2 }
  0x2b   :  { %229 = shalt.err (!%p226_p4)
}
  0x2c   :  { %s230_s0 = scalar_lea.vmem %s55_s15, 256  ;;  %p235_p6 = scmp.lt.s32.totalorder %s55_s15, %s55_s15 }
  0x2d   :  { %p231_p5 = scmp.ne.s32.totalorder %s55_s15, %s230_s0  ;;  %p236_p7 = scmp.lt.s32.totalorder %s230_s0, %s230_s0 }
  0x2f   :  { %p237_p8 = por %p236_p7, %p235_p6 }
  0x31   :  { %p238_p9 = pnand %p237_p8, %p231_p5 }
  0x33   :  { %241 = shalt.err (!%p238_p9)
}
  0x34   :  { %60 = dma.hbm_to_vmem [thread:$0]  %s402_s2, 256, %s55_s15, [#allocation7], %s284_s27, %s284_s27, %s285_s28  }
  0x35   :  { %s242_s5 = scalar_lea.hbm %s403_s3, 256 }
  0x36   :  { %p243_p10 = scmp.ne.s32.totalorder %s403_s3, %s242_s5  ;;  %p246_p11 = scmp.lt.u32.totalorder %s242_s5, %s403_s3 }
  0x38   :  { %p248_p12 = pnand %p246_p11, %p243_p10 }
  0x3a   :  { %251 = shalt.err (!%p248_p12)
}
  0x3b   :  { %s252_s10 = scalar_lea.vmem %s351_s17, 256  ;;  %p257_p0 = scmp.lt.s32.totalorder %s351_s17, %s351_s17 }
  0x3c   :  { %p253_p13 = scmp.ne.s32.totalorder %s351_s17, %s252_s10  ;;  %p258_p1 = scmp.lt.s32.totalorder %s252_s10, %s252_s10 }
  0x3e   :  { %p259_p2 = por %p258_p1, %p257_p0 }
  0x40   :  { %p260_p3 = pnand %p259_p2, %p253_p13 }
  0x42   :  { %263 = shalt.err (!%p260_p3)
}
  0x43   :  { %76 = dma.hbm_to_vmem [thread:$0]  %s403_s3, 256, %s351_s17, [#allocation10], %s284_s27, %s284_s27, %s285_s28  }
  0x44   :  { %274 = dma.done.wait [#allocation4], 256  }
  0x45   :  { %275 = vsyncadd [#allocation4], 4294967040 }
  0x46   :  { %276 = dma.done.wait [#allocation7], 512  }
  0x47   :  { %277 = vsyncadd [#allocation7], 4294966784 }
  0x48   :  { %278 = dma.done.wait [#allocation10], 256  }
  0x49   :  { %279 = vsyncadd [#allocation10], 4294967040  ;;  %v105_v0 = vld [vmem:[#allocation6] sm:$0xff]  ;;  %v106_v1 = vld [vmem:[#allocation6 + $0x8] sm:$0xff]  ;;  %s264_s12 = scalar_lea.hbm %s404_s4, 16 }
  0x4a   :  { %168 = vlog2.f32 %v105_v0  ;;  %v115_v2 = vld [vmem:[#allocation9] sm:$0xff]  ;;  %v116_v3 = vld [vmem:[#allocation9 + $0x8] sm:$0xff]  ;;  %v103_v5 = vld [vmem:[#allocation3] sm:$0xff]  ;;  %p265_p4 = scmp.ne.s32.totalorder %s404_s4, %s264_s12  ;;  %p268_p5 = scmp.lt.u32.totalorder %s264_s12, %s404_s4 }
  0x4b   :  { %170 = vlog2.f32 %v106_v1  ;;  %v104_v7 = vld [vmem:[#allocation3 + $0x8] sm:$0xff]  ;;  %v113_v11 = vld [vmem:[#allocation8] sm:$0xff] }
  0x4c   :  { %172 = vlog2.f32 %v115_v2  ;;  %v114_v14 = vld [vmem:[#allocation8 + $0x8] sm:$0xff]  ;;  %p270_p6 = pnand %p268_p5, %p265_p4 }
  0x4d   :  { %174 = vlog2.f32 %v116_v3 }
  0x54   :  { %v169_v4 = vpop.eup %168 }
  0x55   :  { %v171_v6 = vpop.eup %170  ;;  %v108_v8 = vmul.f32 0.6931472, %v169_v4 }
  0x56   :  { %v173_v9 = vpop.eup %172  ;;  %v110_v10 = vmul.f32 0.6931472, %v171_v6 }
  0x57   :  { %v175_v12 = vpop.eup %174  ;;  %v111_v13 = vmul.f32 %v108_v8, %v103_v5  ;;  %v118_v15 = vmul.f32 0.6931472, %v173_v9 }
  0x58   :  { %v112_v16 = vmul.f32 %v110_v10, %v104_v7  ;;  %v120_v17 = vmul.f32 0.6931472, %v175_v12 }
  0x59   :  { %v121_v18 = vmul.f32 %v118_v15, %v113_v11 }
  0x5a   :  { %v122_v19 = vmul.f32 %v120_v17, %v114_v14 }
  0x5b   :  { %v123_v20 = vadd.f32 %v121_v18, %v111_v13 }
  0x5c   :  { %v124_v21 = vadd.f32 %v122_v19, %v112_v16 }
  0x5e   :  { %v125_v22 = vadd.f32 %v124_v21, %v123_v20 }
  0x60   :  { %132 = vadd.xlane.f32.xlu0 %v125_v22 }
  0xed   :  { %v133_v23 = vpop.xlane.xlu0 %132 }
  0xee   :  { %v134_v24 = vrot.slane %v133_v23, 4 }
  0xf0   :  { %v135_v25 = vadd.f32 %v134_v24, %v133_v23 }
  0xf2   :  { %v136_v26 = vrot.slane %v135_v25, 2 }
  0xf4   :  { %v137_v27 = vadd.f32 %v136_v26, %v135_v25 }
  0xf6   :  { %v138_v28 = vrot.slane %v137_v27, 1 }
  0xf8   :  { %v139_v29 = vadd.f32 %v138_v28, %v137_v27 }
  0xfa   :  { %159 = vpush %v139_v29 }
 0x12b   :  { %s160_s3 = spop %159 }
 0x12c   :  { %142 = sst [smem:[#allocation11]] %s160_s3 }
 0x12d   :  { %273 = shalt.err (!%p270_p6)
}
 0x12e   :  { %s288_s16 = smov [#allocation11]  }
 0x12f   :  { %150 = dma.smem_to_hbm %s288_s16, 16, %s404_s4, [#allocation5]  }
 0x130   :  { %280 = dma.done.wait [#allocation5], 16  }
 0x131   :  { %281 = vsyncadd [#allocation5], 4294967280 }
 0x132   :  { %154 = sfence }
 0x133   :  { %155 = vsyncpa [#allocation4], 1 }
 0x134   :  { %156 = vsyncpa [#allocation7], 1 }
 0x135   :  { %157 = vsyncpa [#allocation10], 1 }
 0x136   :  { %158 = vsyncpa [#allocation5], 1 }

</bundles_post_ra>
